<compile_context>
chip_gen: v7x
topology: tpu7x:2x2x1
jax: 0.10.0
libtpu: 0.0.40
codegen_flags: <defaults>
</compile_context>

<pallas_src>
import functools

import jax
import jax.numpy as jnp
import numpy as np
from jax.experimental import pallas as pl
from jax.experimental.pallas import tpu as pltpu

NEG_SLOPE = 0.2
BN_EPS = 1e-5
MXU_DTYPE = jnp.bfloat16  # MXU inputs; accumulation / BN math stays f32.


def _round_up(x, n):
    return -(-x // n) * n


def _vmem_limit_bytes():
    try:
        cap = int(pltpu.get_tpu_info().vmem_capacity_bytes)
    except Exception:
        # If the query fails, assume the smallest generation (v7x: 64 MiB/TC)
        # so we never request more scoped VMEM than physically exists.
        cap = 64 * 1024 * 1024
    # Use at most half of physical VMEM, capped at 48 MiB (headroom for
    # Mosaic internal scratch + double buffering on every generation).
    return int(min(cap // 2, 48 * 1024 * 1024))


def _choose_tile_m(k_pad, c_out, vmem_limit, max_tile_m=None):
    """M tile (multiple of 128 lanes) for the conv/stats pass.

    Pass-1 streamed bytes per output column: bf16 patch block (k_pad*2) +
    bf16 pre-norm block (c_out*2), each double-buffered by the BlockSpec
    pipeline.  2/3 of the VMEM budget goes to these streams; the rest covers
    the (tiny) weight block, stat accumulators and internal scratch.
    """
    per_col = 2 * (k_pad * 2 + c_out * 2)
    budget = (2 * vmem_limit) // 3
    tm = budget // max(per_col, 1)
    tm = (tm // 128) * 128
    tm = max(128, min(tm, 8192))          # cap so big problems keep >=4-8 steps
    if max_tile_m is not None:
        tm = min(tm, max(128, (int(max_tile_m) // 128) * 128))
    return tm


# ---------------------------------------------------------------------------
# Fused kernel (single M tile covers the layer): conv matmul + batch stats +
# BatchNorm affine + LeakyReLU in one invocation.  No HBM intermediate.
#   p: (K_pad, M_pad) bf16   w: (Cout, K_pad) bf16   g, beta: (Cout, 1) f32
# ---------------------------------------------------------------------------
def _fused_conv_bn_lrelu_kernel(p_ref, w_ref, g_ref, beta_ref, o_ref, *,
                                inv_m, neg_slope, eps):
    z = jnp.dot(w_ref[...], p_ref[...],
                preferred_element_type=jnp.float32)          # (Cout, M) f32
    # Zero-padded M columns give z == 0 -> contribute exactly 0 to the stats.
    s = jnp.sum(z, axis=1, keepdims=True)                    # (Cout, 1)
    ss = jnp.sum(z * z, axis=1, keepdims=True)               # (Cout, 1)
    mean = s * inv_m
    var = jnp.maximum(ss * inv_m - mean * mean, 0.0)
    scale = g_ref[...] * jax.lax.rsqrt(var + eps)
    shift = beta_ref[...] - mean * scale                     # conv bias cancels under BN
    t = z * scale + shift
    o_ref[...] = jnp.where(t >= 0, t, neg_slope * t).astype(o_ref.dtype)


# ---------------------------------------------------------------------------
# Multi-tile pass 1: conv-as-matmul (lane-dense), bf16 pre-norm store,
# per-channel sum / sum-of-squares accumulated per megacore part.
#   grid = (2 parts 'parallel', tiles-per-part 'arbitrary')
# ---------------------------------------------------------------------------
def _conv_stats_kernel(p_ref, w_ref, z_ref, sum_ref, ssq_ref):
    j = pl.program_id(1)                                     # tile within this part
    z = jnp.dot(w_ref[...], p_ref[...],
                preferred_element_type=jnp.float32)          # (Cout, TM) f32
    z_ref[...] = z.astype(z_ref.dtype)                       # bf16 HBM intermediate

    z3 = z[None, :, :]                                       # (1, Cout, TM)
    s = jnp.sum(z3, axis=2, keepdims=True)                   # (1, Cout, 1)
    ss = jnp.sum(z3 * z3, axis=2, keepdims=True)

    @pl.when(j == 0)
    def _():
        sum_ref[...] = s
        ssq_ref[...] = ss

    @pl.when(j > 0)
    def _():
        sum_ref[...] += s
        ssq_ref[...] += ss


# ---------------------------------------------------------------------------
# Multi-tile pass 2: folded BatchNorm affine + LeakyReLU (independent tiles)
# ---------------------------------------------------------------------------
def _bn_lrelu_kernel(z_ref, scale_ref, shift_ref, o_ref, *, neg_slope):
    t = z_ref[...].astype(jnp.float32) * scale_ref[...] + shift_ref[...]
    o_ref[...] = jnp.where(t >= 0, t, neg_slope * t).astype(o_ref.dtype)


# ---------------------------------------------------------------------------
# XLA-side glue: channel-major patch matrix (K on sublanes, M on lanes).
# K ordered (ci, dy, dx) so the weight is a plain OIHW flatten and no
# major<->minor transpose of the expanded matrix is ever materialized.
# ---------------------------------------------------------------------------
def _im2col_cmajor(x_cm, kh, kw, stride, pad, k_pad, m_pad, dtype):
    c, n, h, w = x_cm.shape
    ho = (h + 2 * pad - kh) // stride + 1
    wo = (w + 2 * pad - kw) // stride + 1
    xp = jnp.pad(x_cm.astype(dtype),
                 ((0, 0), (0, 0), (pad, pad), (pad, pad)))
    taps = []
    for dy in range(kh):
        for dx in range(kw):
            ys = slice(dy, dy + stride * (ho - 1) + 1, stride)
            xs = slice(dx, dx + stride * (wo - 1) + 1, stride)
            taps.append(xp[:, :, ys, xs])                    # (C, N, Ho, Wo)
    p = jnp.stack(taps, axis=1)                              # (C, kh*kw, N, Ho, Wo)
    p = p.reshape(c * kh * kw, n * ho * wo)                  # contiguous reshape
    p = jnp.pad(p, ((0, k_pad - c * kh * kw), (0, m_pad - n * ho * wo)))
    return p


def _conv_bn_lrelu_layer(x_cm, w, b, gamma, beta, *, kh, kw, stride, pad,
                         out_dtype, max_tile_m=None,
                         neg_slope=NEG_SLOPE, eps=BN_EPS):
    # x_cm: channel-major (Cin, N, H, W).  Returns channel-major (Cout, N, Ho, Wo).
    # Note: the conv bias `b` cancels exactly under batch normalization
    # (y = z + b -> y - mean_y = z - mean_z), so it never enters the kernels.
    del b
    c_out, c_in = int(w.shape[0]), int(w.shape[1])
    k = c_in * kh * kw
    k_pad = _round_up(k, 16)                                 # bf16: 2 rows / sublane

    _, n, h, wd = x_cm.shape
    ho = (h + 2 * pad - kh) // stride + 1
    wo = (wd + 2 * pad - kw) // stride + 1
    m = n * ho * wo

    vmem_limit = _vmem_limit_bytes()
    tile_m = _choose_tile_m(k_pad, c_out, vmem_limit, max_tile_m)
    m_min = _round_up(m, 128)

    # OIHW weight -> (Cout, K_pad) with K ordered (ci, dy, dx): plain flatten.
    w_mat = w.reshape(c_out, k).astype(MXU_DTYPE)
    w_mat = jnp.pad(w_mat, ((0, 0), (0, k_pad - k)))
    g2 = gamma.astype(jnp.float32).reshape(c_out, 1)
    bt2 = beta.astype(jnp.float32).reshape(c_out, 1)

    if m_min <= tile_m:
        # ---------------- fused single-launch path (small layers) ----------
        m_pad = m_min
        patches = _im2col_cmajor(x_cm, kh, kw, stride, pad, k_pad, m_pad,
                                 MXU_DTYPE)
        out_flat = pl.pallas_call(
            functools.partial(_fused_conv_bn_lrelu_kernel,
                              inv_m=1.0 / m, neg_slope=neg_slope, eps=eps),
            grid=(1,),
            in_specs=[
                pl.BlockSpec((k_pad, m_pad), lambda i: (0, 0)),
                pl.BlockSpec((c_out, k_pad), lambda i: (0, 0)),
                pl.BlockSpec((c_out, 1), lambda i: (0, 0)),
                pl.BlockSpec((c_out, 1), lambda i: (0, 0)),
            ],
            out_specs=pl.BlockSpec((c_out, m_pad), lambda i: (0, 0)),
            out_shape=jax.ShapeDtypeStruct((c_out, m_pad), out_dtype),
            compiler_params=pltpu.CompilerParams(
                dimension_semantics=("arbitrary",),
                vmem_limit_bytes=vmem_limit),
        )(patches, w_mat, g2, bt2)
    else:
        # ---------------- general tiled path --------------------------------
        # Shrink the tile so the pipeline has ~8+ steps to overlap.
        tile_m = min(tile_m, max(512, _round_up(pl.cdiv(m_min, 8), 128)))
        num_tiles = pl.cdiv(m, tile_m)
        num_parts = 2                                        # megacore split (v7x)
        tiles_per_part = pl.cdiv(num_tiles, num_parts)
        num_tiles_pad = num_parts * tiles_per_part
        m_pad = num_tiles_pad * tile_m

        patches = _im2col_cmajor(x_cm, kh, kw, stride, pad, k_pad, m_pad,
                                 MXU_DTYPE)

        # Pass 1: conv matmul + per-part per-channel sum / sum-of-squares.
        z, zsum, zssq = pl.pallas_call(
            _conv_stats_kernel,
            grid=(num_parts, tiles_per_part),
            in_specs=[
                pl.BlockSpec((k_pad, tile_m),
                             lambda p_, j_: (0, p_ * tiles_per_part + j_)),
                pl.BlockSpec((c_out, k_pad), lambda p_, j_: (0, 0)),
            ],
            out_specs=[
                pl.BlockSpec((c_out, tile_m),
                             lambda p_, j_: (0, p_ * tiles_per_part + j_)),
                pl.BlockSpec((1, c_out, 1), lambda p_, j_: (p_, 0, 0)),
                pl.BlockSpec((1, c_out, 1), lambda p_, j_: (p_, 0, 0)),
            ],
            out_shape=[
                jax.ShapeDtypeStruct((c_out, m_pad), MXU_DTYPE),
                jax.ShapeDtypeStruct((num_parts, c_out, 1), jnp.float32),
                jax.ShapeDtypeStruct((num_parts, c_out, 1), jnp.float32),
            ],
            compiler_params=pltpu.CompilerParams(
                dimension_semantics=("parallel", "arbitrary"),
                vmem_limit_bytes=vmem_limit),
        )(patches, w_mat)

        # Tiny scalar fold (biased variance, bias folded analytically).
        s_tot = jnp.sum(zsum, axis=0)                        # (Cout, 1)
        ss_tot = jnp.sum(zssq, axis=0)
        mean = s_tot / m
        var = jnp.maximum(ss_tot / m - mean * mean, 0.0)
        scale = g2 * jax.lax.rsqrt(var + eps)
        shift = bt2 - mean * scale

        # Pass 2: normalize + LeakyReLU (independent tiles -> megacore).
        out_flat = pl.pallas_call(
            functools.partial(_bn_lrelu_kernel, neg_slope=neg_slope),
            grid=(num_tiles_pad,),
            in_specs=[
                pl.BlockSpec((c_out, tile_m), lambda i: (0, i)),
                pl.BlockSpec((c_out, 1), lambda i: (0, 0)),
                pl.BlockSpec((c_out, 1), lambda i: (0, 0)),
            ],
            out_specs=pl.BlockSpec((c_out, tile_m), lambda i: (0, i)),
            out_shape=jax.ShapeDtypeStruct((c_out, m_pad), out_dtype),
            compiler_params=pltpu.CompilerParams(
                dimension_semantics=("parallel",),
                vmem_limit_bytes=vmem_limit),
        )(z, scale, shift)

    # Channel-major output; no inter-layer layout transpose.
    return out_flat[:, :m].reshape(c_out, n, ho, wo)


def conv2d_block_forward(x_nchw, params, max_tile_m=None):
    # NCHW -> channel-major (C, N, H, W); stays channel-major through both layers.
    x_cm = jnp.transpose(x_nchw, (1, 0, 2, 3)).astype(jnp.float32)

    # conv1 (k=3, s=1, p=1) + BN (batch stats) + LeakyReLU; bf16 intermediate.
    y1 = _conv_bn_lrelu_layer(x_cm, params["w1"], params["b1"],
                              params["g1"], params["beta1"],
                              kh=3, kw=3, stride=1, pad=1,
                              out_dtype=jnp.bfloat16, max_tile_m=max_tile_m)

    # conv2 (k=4, s=2, p=1) + BN + LeakyReLU; final output f32.
    y2 = _conv_bn_lrelu_layer(y1, params["w2"], params["b2"],
                              params["g2"], params["beta2"],
                              kh=4, kw=4, stride=2, pad=1,
                              out_dtype=jnp.float32, max_tile_m=max_tile_m)

    return jnp.transpose(y2, (1, 0, 2, 3))                   # channel-major -> NCHW


# ---------------------------------------------------------------------------
# Pure-JAX (f32) reference for a correctness sanity check
# ---------------------------------------------------------------------------
def ref_forward(x_nchw, params):
    def conv(x, w, b, stride, pad):
        y = jax.lax.conv_general_dilated(
            x, w, (stride, stride), ((pad, pad), (pad, pad)),
            dimension_numbers=("NCHW", "OIHW", "NCHW"))
        return y + b.reshape(1, -1, 1, 1)

    def bn(y, g, beta):
        mean = jnp.mean(y, axis=(0, 2, 3), keepdims=True)
        var = jnp.mean(jnp.square(y - mean), axis=(0, 2, 3), keepdims=True)
        return ((y - mean) * jax.lax.rsqrt(var + BN_EPS)
                * g.reshape(1, -1, 1, 1) + beta.reshape(1, -1, 1, 1))

    def lrelu(y):
        return jnp.where(y >= 0, y, NEG_SLOPE * y)

    y = lrelu(bn(conv(x_nchw, params["w1"], params["b1"], 1, 1),
                 params["g1"], params["beta1"]))
    y = lrelu(bn(conv(y, params["w2"], params["b2"], 2, 1),
                 params["g2"], params["beta2"]))
    return y


if __name__ == "__main__":
    # Small, deterministic synthetic setup (no checkpoint loading).
    N, C_IN, H, W = 2, 4, 16, 16
    C_OUT = 8

    key = jax.random.PRNGKey(0)
    ks = jax.random.split(key, 9)
    x = jax.random.normal(ks[0], (N, C_IN, H, W), jnp.float32)

    params = {
        "w1": 0.1 * jax.random.normal(ks[1], (C_OUT, C_IN, 3, 3), jnp.float32),
        "b1": 0.1 * jax.random.normal(ks[2], (C_OUT,), jnp.float32),
        "g1": 1.0 + 0.1 * jax.random.normal(ks[3], (C_OUT,), jnp.float32),
        "beta1": 0.1 * jax.random.normal(ks[4], (C_OUT,), jnp.float32),
        "w2": 0.1 * jax.random.normal(ks[5], (C_OUT, C_OUT, 4, 4), jnp.float32),
        "b2": 0.1 * jax.random.normal(ks[6], (C_OUT,), jnp.float32),
        "g2": 1.0 + 0.1 * jax.random.normal(ks[7], (C_OUT,), jnp.float32),
        "beta2": 0.1 * jax.random.normal(ks[8], (C_OUT,), jnp.float32),
    }

    fwd = jax.jit(conv2d_block_forward, static_argnames=("max_tile_m",))

    # Tolerance: bf16 MXU inputs (f32 accumulation, f32 BN math) give ~1e-2
    # worst-case deviation from the all-f32 reference after two layers.
    TOL = dict(atol=3e-2, rtol=3e-2)

    # 1) Production path: auto tiling -> fully fused single-kernel-per-layer.
    ref = jax.block_until_ready(ref_forward(x, params))
    out = jax.block_until_ready(fwd(x, params))
    assert out.shape == (N, C_OUT, H // 2, W // 2), out.shape
    np.testing.assert_allclose(np.asarray(out), np.asarray(ref), **TOL)

    # 2) Forced small tile (128) -> multi-tile conv+stats path on layer 1,
    #    exercising the cross-tile / cross-part BatchNorm accumulation.
    out_small = jax.block_until_ready(fwd(x, params, max_tile_m=128))
    np.testing.assert_allclose(np.asarray(out_small), np.asarray(ref), **TOL)

    # 3) Non-128-multiple M with an odd tile count (padding + 2-way split).
    x3 = jax.random.normal(ks[0], (1, C_IN, 18, 18), jnp.float32)
    ref3 = jax.block_until_ready(ref_forward(x3, params))
    out3 = jax.block_until_ready(fwd(x3, params, max_tile_m=128))
    np.testing.assert_allclose(np.asarray(out3), np.asarray(ref3), **TOL)

    print("KERNEL_OK")
</pallas_src>

<mosaic_0001>
module attributes {stable_mosaic.version = 11 : i64} {
  func.func @_fused_conv_bn_lrelu_kernel(%arg0: i32, %arg1: memref<48x512xbf16, #tpu.memory_space<vmem>>, %arg2: memref<8x48xbf16, #tpu.memory_space<vmem>>, %arg3: memref<8x1xf32, #tpu.memory_space<vmem>>, %arg4: memref<8x1xf32, #tpu.memory_space<vmem>>, %arg5: memref<8x512xbf16, #tpu.memory_space<vmem>>) attributes {dimension_semantics = [#tpu.dimension_semantics<arbitrary>], iteration_bounds = array<i64: 1>, scalar_prefetch = 0 : i64, scratch_operands = 0 : i64, tpu.core_type = #tpu.core_type<tc>, window_params = [{pipeline_mode = #tpu.pipeline_mode<synchronous>, transform_indices = @transform_0, window_bounds = array<i64: 48, 512>}, {pipeline_mode = #tpu.pipeline_mode<synchronous>, transform_indices = @transform_1, window_bounds = array<i64: 8, 48>}, {pipeline_mode = #tpu.pipeline_mode<synchronous>, transform_indices = @transform_2, window_bounds = array<i64: 8, 1>}, {pipeline_mode = #tpu.pipeline_mode<synchronous>, transform_indices = @transform_3, window_bounds = array<i64: 8, 1>}, {pipeline_mode = #tpu.pipeline_mode<synchronous>, transform_indices = @transform_4, window_bounds = array<i64: 8, 512>}]} {
    %c0 = arith.constant 0 : index
    %c0_0 = arith.constant 0 : index
    %0 = vector.load %arg2[%c0, %c0_0] : memref<8x48xbf16, #tpu.memory_space<vmem>>, vector<8x48xbf16>
    %c0_1 = arith.constant 0 : index
    %c0_2 = arith.constant 0 : index
    %1 = vector.load %arg1[%c0_1, %c0_2] : memref<48x512xbf16, #tpu.memory_space<vmem>>, vector<48x512xbf16>
    %cst = arith.constant dense<0.000000e+00> : vector<8x512xf32>
    %2 = tpu.matmul %0, %1, %cst {dimension_numbers = #tpu.dot_dimension_numbers<[1], [0], [0], [1], [0, 0, 1, 1], [], []>} : vector<8x48xbf16>, vector<48x512xbf16>, vector<8x512xf32> -> vector<8x512xf32>
    %cst_3 = arith.constant dense<0.000000e+00> : vector<8xf32>
    %3 = vector.multi_reduction <add>, %2, %cst_3 [1] : vector<8x512xf32> to vector<8xf32>
    %4 = vector.shape_cast %3 : vector<8xf32> to vector<8x1xf32>
    %5 = arith.mulf %2, %2 : vector<8x512xf32>
    %cst_4 = arith.constant dense<0.000000e+00> : vector<8xf32>
    %6 = vector.multi_reduction <add>, %5, %cst_4 [1] : vector<8x512xf32> to vector<8xf32>
    %7 = vector.shape_cast %6 : vector<8xf32> to vector<8x1xf32>
    %cst_5 = arith.constant 0.001953125 : f32
    %8 = vector.broadcast %cst_5 : f32 to vector<8x1xf32>
    %9 = arith.mulf %4, %8 : vector<8x1xf32>
    %cst_6 = arith.constant 0.001953125 : f32
    %10 = vector.broadcast %cst_6 : f32 to vector<8x1xf32>
    %11 = arith.mulf %7, %10 : vector<8x1xf32>
    %12 = arith.mulf %9, %9 : vector<8x1xf32>
    %13 = arith.subf %11, %12 : vector<8x1xf32>
    %cst_7 = arith.constant 0.000000e+00 : f32
    %14 = vector.broadcast %cst_7 : f32 to vector<8x1xf32>
    %15 = arith.maximumf %13, %14 : vector<8x1xf32>
    %c0_8 = arith.constant 0 : index
    %c0_9 = arith.constant 0 : index
    %16 = vector.load %arg3[%c0_8, %c0_9] : memref<8x1xf32, #tpu.memory_space<vmem>>, vector<8x1xf32>
    %cst_10 = arith.constant 9.99999974E-6 : f32
    %17 = vector.broadcast %cst_10 : f32 to vector<8x1xf32>
    %18 = arith.addf %15, %17 : vector<8x1xf32>
    %19 = math.rsqrt %18 : vector<8x1xf32>
    %20 = arith.mulf %16, %19 : vector<8x1xf32>
    %c0_11 = arith.constant 0 : index
    %c0_12 = arith.constant 0 : index
    %21 = vector.load %arg4[%c0_11, %c0_12] : memref<8x1xf32, #tpu.memory_space<vmem>>, vector<8x1xf32>
    %22 = arith.mulf %9, %20 : vector<8x1xf32>
    %23 = arith.subf %21, %22 : vector<8x1xf32>
    %24 = vector.broadcast %20 : vector<8x1xf32> to vector<8x512xf32>
    %25 = arith.mulf %2, %24 : vector<8x512xf32>
    %26 = vector.broadcast %23 : vector<8x1xf32> to vector<8x512xf32>
    %27 = arith.addf %25, %26 : vector<8x512xf32>
    %cst_13 = arith.constant 0.000000e+00 : f32
    %28 = vector.broadcast %cst_13 : f32 to vector<8x512xf32>
    %29 = arith.cmpf oge, %27, %28 : vector<8x512xf32>
    %cst_14 = arith.constant 2.000000e-01 : f32
    %30 = vector.broadcast %cst_14 : f32 to vector<8x512xf32>
    %31 = arith.mulf %30, %27 : vector<8x512xf32>
    %32 = arith.select %29, %27, %31 : vector<8x512xi1>, vector<8x512xf32>
    %33 = arith.truncf %32 : vector<8x512xf32> to vector<8x512xbf16>
    %c0_15 = arith.constant 0 : index
    %c0_16 = arith.constant 0 : index
    %34 = vector.load %arg5[%c0_15, %c0_16] : memref<8x512xbf16, #tpu.memory_space<vmem>>, vector<8x512xbf16>
    tpu.vector_store %arg5[%c0_15, %c0_16], %33 {strides = array<i32>} : memref<8x512xbf16, #tpu.memory_space<vmem>>, vector<8x512xbf16>,
    return
  }
  func.func @transform_0(%arg0: i32) -> (i32, i32) {
    %c0_i32 = arith.constant 0 : i32
    %c0_i32_0 = arith.constant 0 : i32
    %c0_i32_1 = arith.constant 0 : i32
    return %c0_i32, %c0_i32_0 : i32, i32
  }
  func.func @transform_1(%arg0: i32) -> (i32, i32) {
    %c0_i32 = arith.constant 0 : i32
    %c0_i32_0 = arith.constant 0 : i32
    %c0_i32_1 = arith.constant 0 : i32
    return %c0_i32, %c0_i32_0 : i32, i32
  }
  func.func @transform_2(%arg0: i32) -> (i32, i32) {
    %c0_i32 = arith.constant 0 : i32
    %c0_i32_0 = arith.constant 0 : i32
    %c0_i32_1 = arith.constant 0 : i32
    return %c0_i32, %c0_i32_0 : i32, i32
  }
  func.func @transform_3(%arg0: i32) -> (i32, i32) {
    %c0_i32 = arith.constant 0 : i32
    %c0_i32_0 = arith.constant 0 : i32
    %c0_i32_1 = arith.constant 0 : i32
    return %c0_i32, %c0_i32_0 : i32, i32
  }
  func.func @transform_4(%arg0: i32) -> (i32, i32) {
    %c0_i32 = arith.constant 0 : i32
    %c0_i32_0 = arith.constant 0 : i32
    %c0_i32_1 = arith.constant 0 : i32
    return %c0_i32, %c0_i32_0 : i32, i32
  }
}

module attributes {stable_mosaic.version = 11 : i64} {
  func.func @_fused_conv_bn_lrelu_kernel(%arg0: i32, %arg1: memref<128x128xbf16, #tpu.memory_space<vmem>>, %arg2: memref<8x128xbf16, #tpu.memory_space<vmem>>, %arg3: memref<8x1xf32, #tpu.memory_space<vmem>>, %arg4: memref<8x1xf32, #tpu.memory_space<vmem>>, %arg5: memref<8x128xf32, #tpu.memory_space<vmem>>) attributes {dimension_semantics = [#tpu.dimension_semantics<arbitrary>], iteration_bounds = array<i64: 1>, scalar_prefetch = 0 : i64, scratch_operands = 0 : i64, tpu.core_type = #tpu.core_type<tc>, window_params = [{pipeline_mode = #tpu.pipeline_mode<synchronous>, transform_indices = @transform_0, window_bounds = array<i64: 128, 128>}, {pipeline_mode = #tpu.pipeline_mode<synchronous>, transform_indices = @transform_1, window_bounds = array<i64: 8, 128>}, {pipeline_mode = #tpu.pipeline_mode<synchronous>, transform_indices = @transform_2, window_bounds = array<i64: 8, 1>}, {pipeline_mode = #tpu.pipeline_mode<synchronous>, transform_indices = @transform_3, window_bounds = array<i64: 8, 1>}, {pipeline_mode = #tpu.pipeline_mode<synchronous>, transform_indices = @transform_4, window_bounds = array<i64: 8, 128>}]} {
    %c0 = arith.constant 0 : index
    %c0_0 = arith.constant 0 : index
    %0 = vector.load %arg2[%c0, %c0_0] : memref<8x128xbf16, #tpu.memory_space<vmem>>, vector<8x128xbf16>
    %c0_1 = arith.constant 0 : index
    %c0_2 = arith.constant 0 : index
    %1 = vector.load %arg1[%c0_1, %c0_2] : memref<128x128xbf16, #tpu.memory_space<vmem>>, vector<128x128xbf16>
    %cst = arith.constant dense<0.000000e+00> : vector<8x128xf32>
    %2 = tpu.matmul %0, %1, %cst {dimension_numbers = #tpu.dot_dimension_numbers<[1], [0], [0], [1], [0, 0, 1, 1], [], []>} : vector<8x128xbf16>, vector<128x128xbf16>, vector<8x128xf32> -> vector<8x128xf32>
    %cst_3 = arith.constant dense<0.000000e+00> : vector<8xf32>
    %3 = vector.multi_reduction <add>, %2, %cst_3 [1] : vector<8x128xf32> to vector<8xf32>
    %4 = vector.shape_cast %3 : vector<8xf32> to vector<8x1xf32>
    %5 = arith.mulf %2, %2 : vector<8x128xf32>
    %cst_4 = arith.constant dense<0.000000e+00> : vector<8xf32>
    %6 = vector.multi_reduction <add>, %5, %cst_4 [1] : vector<8x128xf32> to vector<8xf32>
    %7 = vector.shape_cast %6 : vector<8xf32> to vector<8x1xf32>
    %cst_5 = arith.constant 7.812500e-03 : f32
    %8 = vector.broadcast %cst_5 : f32 to vector<8x1xf32>
    %9 = arith.mulf %4, %8 : vector<8x1xf32>
    %cst_6 = arith.constant 7.812500e-03 : f32
    %10 = vector.broadcast %cst_6 : f32 to vector<8x1xf32>
    %11 = arith.mulf %7, %10 : vector<8x1xf32>
    %12 = arith.mulf %9, %9 : vector<8x1xf32>
    %13 = arith.subf %11, %12 : vector<8x1xf32>
    %cst_7 = arith.constant 0.000000e+00 : f32
    %14 = vector.broadcast %cst_7 : f32 to vector<8x1xf32>
    %15 = arith.maximumf %13, %14 : vector<8x1xf32>
    %c0_8 = arith.constant 0 : index
    %c0_9 = arith.constant 0 : index
    %16 = vector.load %arg3[%c0_8, %c0_9] : memref<8x1xf32, #tpu.memory_space<vmem>>, vector<8x1xf32>
    %cst_10 = arith.constant 9.99999974E-6 : f32
    %17 = vector.broadcast %cst_10 : f32 to vector<8x1xf32>
    %18 = arith.addf %15, %17 : vector<8x1xf32>
    %19 = math.rsqrt %18 : vector<8x1xf32>
    %20 = arith.mulf %16, %19 : vector<8x1xf32>
    %c0_11 = arith.constant 0 : index
    %c0_12 = arith.constant 0 : index
    %21 = vector.load %arg4[%c0_11, %c0_12] : memref<8x1xf32, #tpu.memory_space<vmem>>, vector<8x1xf32>
    %22 = arith.mulf %9, %20 : vector<8x1xf32>
    %23 = arith.subf %21, %22 : vector<8x1xf32>
    %24 = vector.broadcast %20 : vector<8x1xf32> to vector<8x128xf32>
    %25 = arith.mulf %2, %24 : vector<8x128xf32>
    %26 = vector.broadcast %23 : vector<8x1xf32> to vector<8x128xf32>
    %27 = arith.addf %25, %26 : vector<8x128xf32>
    %cst_13 = arith.constant 0.000000e+00 : f32
    %28 = vector.broadcast %cst_13 : f32 to vector<8x128xf32>
    %29 = arith.cmpf oge, %27, %28 : vector<8x128xf32>
    %cst_14 = arith.constant 2.000000e-01 : f32
    %30 = vector.broadcast %cst_14 : f32 to vector<8x128xf32>
    %31 = arith.mulf %30, %27 : vector<8x128xf32>
    %32 = arith.select %29, %27, %31 : vector<8x128xi1>, vector<8x128xf32>
    %c0_15 = arith.constant 0 : index
    %c0_16 = arith.constant 0 : index
    %33 = vector.load %arg5[%c0_15, %c0_16] : memref<8x128xf32, #tpu.memory_space<vmem>>, vector<8x128xf32>
    tpu.vector_store %arg5[%c0_15, %c0_16], %32 {strides = array<i32>} : memref<8x128xf32, #tpu.memory_space<vmem>>, vector<8x128xf32>,
    return
  }
  func.func @transform_0(%arg0: i32) -> (i32, i32) {
    %c0_i32 = arith.constant 0 : i32
    %c0_i32_0 = arith.constant 0 : i32
    %c0_i32_1 = arith.constant 0 : i32
    return %c0_i32, %c0_i32_0 : i32, i32
  }
  func.func @transform_1(%arg0: i32) -> (i32, i32) {
    %c0_i32 = arith.constant 0 : i32
    %c0_i32_0 = arith.constant 0 : i32
    %c0_i32_1 = arith.constant 0 : i32
    return %c0_i32, %c0_i32_0 : i32, i32
  }
  func.func @transform_2(%arg0: i32) -> (i32, i32) {
    %c0_i32 = arith.constant 0 : i32
    %c0_i32_0 = arith.constant 0 : i32
    %c0_i32_1 = arith.constant 0 : i32
    return %c0_i32, %c0_i32_0 : i32, i32
  }
  func.func @transform_3(%arg0: i32) -> (i32, i32) {
    %c0_i32 = arith.constant 0 : i32
    %c0_i32_0 = arith.constant 0 : i32
    %c0_i32_1 = arith.constant 0 : i32
    return %c0_i32, %c0_i32_0 : i32, i32
  }
  func.func @transform_4(%arg0: i32) -> (i32, i32) {
    %c0_i32 = arith.constant 0 : i32
    %c0_i32_0 = arith.constant 0 : i32
    %c0_i32_1 = arith.constant 0 : i32
    return %c0_i32, %c0_i32_0 : i32, i32
  }
}

</mosaic_0001>

<bundles_post_ra>
// kernel: conv2d_block_forward.2
= control target key start
LH: loop header
LB: loop body
LE: loop exit
PB: predicated region body
PF: predicated region fallthrough
CT: control target
= control target key end

     0   :  { %v296_v1 = vmov 0   ;;  %vm91_vm0 = vcmask 392192   ;;  %s373_s0 = inlined_call_operand.vmem [shape: bf16[48,512], index: 0, kind: input, shape index: {}]   ;;  %s374_s1 = inlined_call_operand.vmem [shape: bf16[8,48], index: 1, kind: input, shape index: {}]   ;;  %s375_s2 = inlined_call_operand.vmem [shape: f32[8,1], index: 2, kind: input, shape index: {}]   ;;  %s376_s3 = inlined_call_operand.vmem [shape: f32[8,1], index: 3, kind: input, shape index: {}]   ;;  %s377_s4 = inlined_call_operand.vmem [shape: bf16[8,512], index: 4, kind: output, shape index: {}]  }
   0x1   :  { %v276_v0 = vld [vmem:[%s373_s0 + $0x4] ss:$16 sps:$4 sm:$0xff]   ;;  %127 = vmatprep.mubr.bf16.mxu0 %v296_v1  ;;  %168 = vmatprep.mubr.bf16.mxu1 %v296_v1  ;;  %v278_v2 = vld [vmem:[%s373_s0 + $0xc] ss:$16 sps:$4 sm:$0xff]   ;;  %v280_v3 = vld [vmem:[%s373_s0] ss:$16 sps:$4 sm:$0xff]  }
   0x2   :  { %274 = vset.pattern.permute.xlu1 %v296_v1  ;;  %275 = vset.pattern.permute.xlu0 %v296_v1  ;;  %v281_v4 = vld [vmem:[%s373_s0 + $0x8] ss:$16 sps:$4 sm:$0xff]   ;;  %v282_v5 = vld [vmem:[%s373_s0 + $0x24] ss:$16 sps:$4 sm:$0xff]   ;;  %v284_v6 = vld [vmem:[%s373_s0 + $0x2c] ss:$16 sps:$4 sm:$0xff]  }
   0x3   :  { %95 = vmatprep.subr.bf16.mxu0 %v276_v0  ;;  %136 = vmatprep.subr.bf16.mxu1 %v278_v2  ;;  %v286_v7 = vld [vmem:[%s373_s0 + $0x20] ss:$16 sps:$4 sm:$0xff]   ;;  %v287_v8 = vld [vmem:[%s373_s0 + $0x28] ss:$16 sps:$4 sm:$0xff]   ;;  %v288_v9 = vld [vmem:[%s373_s0 + $0x44] ss:$16 sps:$4 sm:$0xff]  }
   0x4   :  { %96 = vmatpush1.bf16.msra.mxu0 %v280_v3  ;;  %137 = vmatpush1.bf16.msra.mxu1 %v281_v4  ;;  %v290_v10 = vld [vmem:[%s373_s0 + $0x4c] ss:$16 sps:$4 sm:$0xff]   ;;  %v292_v11 = vld [vmem:[%s373_s0 + $0x40] ss:$16 sps:$4 sm:$0xff]   ;;  %v293_v12 = vld [vmem:[%s373_s0 + $0x48] ss:$16 sps:$4 sm:$0xff]  }
   0x5   :  { %97 = vmatprep.subr.bf16.mxu0 %v282_v5  ;;  %138 = vmatprep.subr.bf16.mxu1 %v284_v6  ;;  %v18_v13 = vld [vmem:[%s374_s1] sm:$0xf] }
   0x6   :  { %v196_v40 = vld [vmem:[%s375_s2] sm:$0xff] }
   0x7   :  { %v200_v43 = vld [vmem:[%s376_s3] sm:$0xff] }
   0x8   :  { %98 = vmatpush1.bf16.msra.mxu0 %v286_v7  ;;  %139 = vmatpush1.bf16.msra.mxu1 %v287_v8 }
   0x9   :  { %99 = vmatprep.subr.bf16.mxu0 %v288_v9  ;;  %140 = vmatprep.subr.bf16.mxu1 %v290_v10 }
   0xc   :  { %100 = vmatpush1.bf16.msra.mxu0 %v292_v11  ;;  %141 = vmatpush1.bf16.msra.mxu1 %v293_v12 }
   0xf   :  { %267 = vmatmul.mubr.msk.bf16.vlgmr.msra.gmra.mrb[0].mxu0 %vm91_vm0, %v18_v13  ;;  %268 = vmatmul.mubr.msk.bf16.vlgmr.msra.gmra.mrb[0].mxu1 %vm91_vm0, %v18_v13 }
  0xe2   :  { %v129_v14 = vpop.f32.mrb[0].mxu0  ;;  %v170_v15 = vpop.f32.mrb[0].mxu1 }
  0xe3   :  { %v182_v16 = vmul.f32 %v129_v14, %v129_v14  ;;  %v131_v17 = vpop.f32.mrb[1].mxu0  ;;  %v172_v18 = vpop.f32.mrb[1].mxu1  ;;  %v184_v19 = vmul.f32 %v170_v15, %v170_v15 }
  0xe4   :  { %v177_v20 = vadd.f32 %v131_v17, %v129_v14  ;;  %v183_v21 = vmul.f32 %v131_v17, %v131_v17  ;;  %v133_v22 = vpop.f32.mrb[2].mxu0  ;;  %v174_v23 = vpop.f32.mrb[2].mxu1  ;;  %v185_v29 = vmul.f32 %v172_v18, %v172_v18 }
  0xe5   :  { %v134_v24 = vpop.f32.mrb[3].mxu0  ;;  %v175_v25 = vpop.f32.mrb[3].mxu1 }
  0xe6   :  { %v178_v26 = vadd.f32 %v177_v20, %v170_v15  ;;  %v186_v27 = vadd.f32 %v183_v21, %v182_v16 }
  0xe8   :  { %v179_v28 = vadd.f32 %v178_v26, %v172_v18  ;;  %v187_v30 = vadd.f32 %v186_v27, %v184_v19 }
  0xea   :  { %180 = vadd.xlane.f32.xlu0 %v179_v28  ;;  %v188_v31 = vadd.f32 %v187_v30, %v185_v29 }
  0xee   :  { %189 = vadd.xlane.f32.xlu0 %v188_v31 }
 0x177   :  { %v181_v32 = vpop.xlane.xlu0 %180 }
 0x178   :  { %v191_v33 = vmul.f32 0.001953125, %v181_v32 }
 0x17a   :  { %v193_v35 = vmul.f32 %v191_v33, %v191_v33 }
 0x17b   :  { %v190_v34 = vpop.xlane.xlu0 %189 }
 0x17c   :  { %v192_v36 = vmul.f32 0.001953125, %v190_v34 }
 0x17e   :  { %v194_v37 = vsub.f32 %v192_v36, %v193_v35 }
 0x180   :  { %v195_v38 = vmax.f32 %v194_v37, 0.0 }
 0x182   :  { %v197_v39 = vadd.f32 1e-05, %v195_v38 }
 0x184   :  { %294 = vrsqrt.f32 %v197_v39 }
 0x18e   :  { %v295_v41 = vpop.eup %294 }
 0x18f   :  { %v199_v42 = vmul.f32 %v295_v41, %v196_v40 }
 0x191   :  { %205 = vperm.xlu1 %274, %v199_v42   ;;  %v201_v44 = vmul.f32 %v199_v42, %v191_v33 }
 0x193   :  { %v202_v45 = vsub.f32 %v200_v43, %v201_v44 }
 0x195   :  { %214 = vperm.xlu1 %274, %v202_v45  }
 0x210   :  { %v206_v46 = vpop.permute.xlu1 %205 }
 0x211   :  { %v208_v47 = vmul.f32 %v206_v46, %v129_v14  ;;  %v209_v48 = vmul.f32 %v206_v46, %v131_v17  ;;  %v210_v49 = vmul.f32 %v206_v46, %v170_v15  ;;  %v211_v50 = vmul.f32 %v206_v46, %v172_v18 }
 0x214   :  { %v215_v51 = vpop.permute.xlu1 %214 }
 0x215   :  { %v217_v52 = vadd.f32 %v215_v51, %v208_v47  ;;  %v218_v53 = vadd.f32 %v215_v51, %v209_v48  ;;  %v219_v54 = vadd.f32 %v215_v51, %v210_v49  ;;  %v220_v55 = vadd.f32 %v215_v51, %v211_v50 }
 0x217   :  { %vm221_vm1 = vcmp.ge.f32.partialorder %v217_v52, 0.0  ;;  %vm222_vm2 = vcmp.ge.f32.partialorder %v218_v53, 0.0  ;;  %vm223_vm3 = vcmp.ge.f32.partialorder %v219_v54, 0.0  ;;  %vm224_vm4 = vcmp.ge.f32.partialorder %v220_v55, 0.0 }
 0x218   :  { %v225_v56 = vmul.f32 0.2, %v217_v52  ;;  %v226_v57 = vmul.f32 0.2, %v218_v53  ;;  %v227_v58 = vmul.f32 0.2, %v219_v54 }
 0x219   :  { %v228_v59 = vmul.f32 0.2, %v220_v55 }
 0x21a   :  { %v229_v60 = vsel %vm221_vm1, %v217_v52, %v225_v56  ;;  %v230_v61 = vsel %vm222_vm2, %v218_v53, %v226_v57  ;;  %v231_v62 = vsel %vm223_vm3, %v219_v54, %v227_v58 }
 0x21b   :  { %v232_v63 = vsel %vm224_vm4, %v220_v55, %v228_v59  ;;  %v271_v0 = vpack.c.bf16 %v230_v61, %v229_v60 }
 0x21c   :  { %v272_v1 = vpack.c.bf16 %v232_v63, %v231_v62 }
 0x21d   :  { %249 = vst [vmem:[%s377_s4] sm:$0xff] %v271_v0 }
 0x21e   :  { %250 = vst [vmem:[%s377_s4 + $0x8] sm:$0xff] %v272_v1 }

// kernel: conv2d_block_forward.3
= control target key start
LH: loop header
LB: loop body
LE: loop exit
PB: predicated region body
PF: predicated region fallthrough
CT: control target
= control target key end

     0   :  { %v212_v0 = vmov 0.0   ;;  %vm213_vm0 = vmmov 0   ;;  %v214_v15 = vmov 0   ;;  %s276_s0 = inlined_call_operand.vmem [shape: bf16[128,128], index: 0, kind: input, shape index: {}]   ;;  %s277_s1 = inlined_call_operand.vmem [shape: bf16[8,128], index: 1, kind: input, shape index: {}]   ;;  %s278_s2 = inlined_call_operand.vmem [shape: f32[8,1], index: 2, kind: input, shape index: {}]   ;;  %s279_s3 = inlined_call_operand.vmem [shape: f32[8,1], index: 3, kind: input, shape index: {}]   ;;  %s280_s4 = inlined_call_operand.vmem [shape: f32[8,128], index: 4, kind: output, shape index: {}]  }
   0x1   :  { %177 = vmatprep.subr.bf16.mxu0 %v212_v0  ;;  %v202_v1 = vld [vmem:[%s276_s0] sm:$0xff]   ;;  %193 = vmatprep.mubr.msk.bf16.mxu0 %vm213_vm0, %v212_v0  ;;  %v203_v2 = vld [vmem:[%s276_s0 + $0x8] sm:$0xff]   ;;  %v204_v3 = vld [vmem:[%s276_s0 + $0x10] sm:$0xff]  }
   0x2   :  { %178 = vmatpush3.bf16.msra.mxu0 %v202_v1  ;;  %v205_v4 = vld [vmem:[%s276_s0 + $0x18] sm:$0xff]   ;;  %v206_v5 = vld [vmem:[%s276_s0 + $0x20] sm:$0xff]   ;;  %v207_v6 = vld [vmem:[%s276_s0 + $0x28] sm:$0xff]   ;;  %200 = vset.pattern.permute.xlu1 %v214_v15 }
   0x3   :  { %179 = vmatprep.subr.bf16.mxu0 %v212_v0  ;;  %v208_v7 = vld [vmem:[%s276_s0 + $0x30] sm:$0xff]   ;;  %v209_v8 = vld [vmem:[%s276_s0 + $0x38] sm:$0xff]   ;;  %v18_v9 = vld [vmem:[%s277_s1] sm:$0xf]  ;;  %201 = vset.pattern.permute.xlu0 %v214_v15 }
   0x4   :  { %v133_v24 = vld [vmem:[%s278_s2] sm:$0xff] }
   0x5   :  { %v137_v27 = vld [vmem:[%s279_s3] sm:$0xff] }
   0x6   :  { %180 = vmatpush3.bf16.msra.mxu0 %v203_v2 }
   0x7   :  { %181 = vmatprep.subr.bf16.mxu0 %v212_v0 }
   0xa   :  { %182 = vmatpush3.bf16.msra.mxu0 %v204_v3 }
   0xb   :  { %183 = vmatprep.subr.bf16.mxu0 %v212_v0 }
   0xe   :  { %184 = vmatpush3.bf16.msra.mxu0 %v205_v4 }
   0xf   :  { %185 = vmatprep.subr.bf16.mxu0 %v212_v0 }
  0x12   :  { %186 = vmatpush3.bf16.msra.mxu0 %v206_v5 }
  0x13   :  { %187 = vmatprep.subr.bf16.mxu0 %v212_v0 }
  0x16   :  { %188 = vmatpush3.bf16.msra.mxu0 %v207_v6 }
  0x17   :  { %189 = vmatprep.subr.bf16.mxu0 %v212_v0 }
  0x1a   :  { %190 = vmatpush3.bf16.msra.mxu0 %v208_v7 }
  0x1b   :  { %191 = vmatprep.subr.bf16.mxu0 %v212_v0 }
  0x1e   :  { %192 = vmatpush3.bf16.msra.mxu0 %v209_v8 }
  0x21   :  { %194 = vmatmul.mubr.bf16.vlgmr.msra.gmra.mrb[0].mxu0 %v18_v9 }
  0xf4   :  { %v117_v10 = vpop.f32.mrb[0].mxu0 }
  0xf5   :  { %123 = vadd.xlane.f32.xlu0 %v117_v10  ;;  %v195_v11 = vpop.f32.mrb[1].mxu0  ;;  %v125_v14 = vmul.f32 %v117_v10, %v117_v10 }
  0xf6   :  { %v120_v12 = vpop.f32.mrb[2].mxu0 }
  0xf7   :  { %v196_v13 = vpop.f32.mrb[3].mxu0 }
  0xf9   :  { %126 = vadd.xlane.f32.xlu0 %v125_v14 }
 0x182   :  { %v124_v16 = vpop.xlane.xlu0 %123 }
 0x183   :  { %v128_v17 = vmul.f32 0.0078125, %v124_v16 }
 0x185   :  { %v130_v19 = vmul.f32 %v128_v17, %v128_v17 }
 0x186   :  { %v127_v18 = vpop.xlane.xlu0 %126 }
 0x187   :  { %v129_v20 = vmul.f32 0.0078125, %v127_v18 }
 0x189   :  { %v131_v21 = vsub.f32 %v129_v20, %v130_v19 }
 0x18b   :  { %v132_v22 = vmax.f32 %v131_v21, 0.0 }
 0x18d   :  { %v134_v23 = vadd.f32 1e-05, %v132_v22 }
 0x18f   :  { %210 = vrsqrt.f32 %v134_v23 }
 0x199   :  { %v211_v25 = vpop.eup %210 }
 0x19a   :  { %v136_v26 = vmul.f32 %v211_v25, %v133_v24 }
 0x19c   :  { %142 = vperm.xlu1 %200, %v136_v26   ;;  %v138_v28 = vmul.f32 %v136_v26, %v128_v17 }
 0x19e   :  { %v139_v29 = vsub.f32 %v137_v27, %v138_v28 }
 0x1a0   :  { %148 = vperm.xlu1 %200, %v139_v29  }
 0x21b   :  { %v143_v30 = vpop.permute.xlu1 %142 }
 0x21c   :  { %v145_v31 = vmul.f32 %v143_v30, %v117_v10 }
 0x21f   :  { %v149_v32 = vpop.permute.xlu1 %148 }
 0x220   :  { %v151_v33 = vadd.f32 %v149_v32, %v145_v31 }
 0x222   :  { %vm152_vm1 = vcmp.ge.f32.partialorder %v151_v33, 0.0  ;;  %v153_v34 = vmul.f32 0.2, %v151_v33 }
 0x224   :  { %v154_v35 = vsel %vm152_vm1, %v151_v33, %v153_v34 }
 0x225   :  { %155 = vst [vmem:[%s280_s4] sm:$0xff] %v154_v35 }

</bundles_post_ra>
